<compile_context>
chip_gen: v7x
topology: tpu7x:2x2x1
jax: 0.10.0
libtpu: 0.0.40
codegen_flags: <defaults>
</compile_context>

<pallas_src>
import functools

import jax
import jax.numpy as jnp
from jax.experimental import pallas as pl
from jax.experimental.pallas import tpu as pltpu


def _softmax_t_kernel(x_ref, o_ref, *, inv_temp, axis):
    # Block shapes: (1, C, TILE_S, 128) in the tiled path, (1, C, HW) in the
    # fallback path. `axis` is the channel (reduction) axis of the block.
    x = x_ref[...].astype(jnp.float32)
    m = jnp.max(x, axis=axis, keepdims=True)
    # temperature > 0  =>  max(x / T) == max(x) / T, so fold the scale into the
    # exp argument (removes one full-size VPU multiply on the pre-reduce pass).
    e = jnp.exp((x - m) * inv_temp)
    s = jnp.sum(e, axis=axis, keepdims=True)
    # Reciprocal of the reduced row + multiply instead of a full-tensor divide.
    # approx=False keeps full precision (the test tolerance is 1e-5).
    inv_s = pl.reciprocal(s, approx=False)
    o_ref[...] = (e * inv_s).astype(o_ref.dtype)


def _pick_tile_s(s, max_tile):
    """Largest divisor of `s` that is <= max_tile, preferring multiples of 8."""
    max_tile = max(1, min(s, max_tile))
    if s <= max_tile:
        return s
    best_any, best_8 = 1, None
    for t in range(1, max_tile + 1):
        if s % t == 0:
            best_any = t
            if t % 8 == 0:
                best_8 = t
    return best_8 if best_8 is not None else best_any


def softmax_t(x, temperature, dim=1):
    """y = softmax(x / temperature, axis=dim) for NCHW input (dim=1 only)."""
    assert dim == 1, "kernel implemented for dim=1 (channel softmax, NCHW input)"
    # TODO(synk): general `dim` support (SoftmaxT allows arbitrary dim) not implemented.
    temperature = float(temperature)  # must be a static Python scalar
    assert temperature > 0.0, "temperature must be > 0 for the folded-max formulation"
    inv_temp = 1.0 / temperature

    N, C, H, W = x.shape
    HW = H * W
    itemsize = jnp.dtype(x.dtype).itemsize

    cost = pl.CostEstimate(
        flops=5 * N * C * HW,
        transcendentals=N * C * HW,
        bytes_accessed=2 * N * C * HW * itemsize,
    )
    vmem_limit = 48 * 1024 * 1024  # safe on v7x (64 MiB physical), roomy on v5e/v6e

    if HW % 128 == 0:
        # Lane-dense tiled path.
        S = HW // 128
        # Keep the f32 working set per block around <= 2 MiB:
        #   C * TILE_S * 128 * 4B <= 2 MiB  =>  C * TILE_S <= 4096
        max_tile_s = max(1, 4096 // C)
        tile_s = _pick_tile_s(S, max_tile_s)
        x4 = x.reshape(N, C, S, 128)
        kernel = functools.partial(_softmax_t_kernel, inv_temp=inv_temp, axis=1)
        out = pl.pallas_call(
            kernel,
            out_shape=jax.ShapeDtypeStruct((N, C, S, 128), x.dtype),
            grid_spec=pltpu.PrefetchScalarGridSpec(
                num_scalar_prefetch=0,
                grid=(N, S // tile_s),
                in_specs=[pl.BlockSpec((1, C, tile_s, 128),
                                       lambda n, h: (n, 0, h, 0))],
                out_specs=pl.BlockSpec((1, C, tile_s, 128),
                                       lambda n, h: (n, 0, h, 0)),
            ),
            compiler_params=pltpu.CompilerParams(
                dimension_semantics=("parallel", "parallel"),
                vmem_limit_bytes=vmem_limit,
            ),
            cost_estimate=cost,
        )(x4)
        return out.reshape(N, C, H, W)

    # Fallback: HW not a multiple of 128 -> full (1, C, HW) slab per batch.
    x3 = x.reshape(N, C, HW)
    kernel = functools.partial(_softmax_t_kernel, inv_temp=inv_temp, axis=1)
    out = pl.pallas_call(
        kernel,
        out_shape=jax.ShapeDtypeStruct((N, C, HW), x.dtype),
        grid_spec=pltpu.PrefetchScalarGridSpec(
            num_scalar_prefetch=0,
            grid=(N,),
            in_specs=[pl.BlockSpec((1, C, HW), lambda n: (n, 0, 0))],
            out_specs=pl.BlockSpec((1, C, HW), lambda n: (n, 0, 0)),
        ),
        compiler_params=pltpu.CompilerParams(
            dimension_semantics=("parallel",),
            vmem_limit_bytes=vmem_limit,
        ),
        cost_estimate=cost,
    )(x3)
    return out.reshape(N, C, H, W)


if __name__ == "__main__":
    key = jax.random.PRNGKey(0)
    N, C, H, W = 2, 4, 16, 16          # small NCHW example
    temperature = 2.0

    x = jax.random.normal(key, (N, C, H, W), dtype=jnp.float32)

    y = softmax_t(x, temperature, dim=1)
    y = jax.block_until_ready(y)

    # reference check (plain JAX)
    y_ref = jax.nn.softmax(x / temperature, axis=1)
    assert jnp.allclose(y, y_ref, atol=1e-5, rtol=1e-5), "mismatch vs reference"
    assert jnp.allclose(jnp.sum(y, axis=1), 1.0, atol=1e-5), "softmax not normalized"

    print("KERNEL_OK")
</pallas_src>

<mosaic_0001>
module attributes {stable_mosaic.version = 11 : i64} {
  func.func @_softmax_t_kernel(%arg0: i32, %arg1: i32, %arg2: memref<1x4x2x128xf32, #tpu.memory_space<vmem>>, %arg3: memref<1x4x2x128xf32, #tpu.memory_space<vmem>>) attributes {dimension_semantics = [#tpu.dimension_semantics<parallel>, #tpu.dimension_semantics<parallel>], iteration_bounds = array<i64: 2, 1>, scalar_prefetch = 0 : i64, scratch_operands = 0 : i64, tpu.core_type = #tpu.core_type<tc>, window_params = [{transform_indices = @transform_0, window_bounds = array<i64: 1, 4, 2, 128>}, {transform_indices = @transform_1, window_bounds = array<i64: 1, 4, 2, 128>}]} {
    %c0 = arith.constant 0 : index
    %c0_0 = arith.constant 0 : index
    %c0_1 = arith.constant 0 : index
    %c0_2 = arith.constant 0 : index
    %0 = vector.load %arg2[%c0, %c0_0, %c0_1, %c0_2] : memref<1x4x2x128xf32, #tpu.memory_space<vmem>>, vector<1x4x2x128xf32>
    %cst = arith.constant dense<0xFF800000> : vector<1x2x128xf32>
    %1 = vector.multi_reduction <maximumf>, %0, %cst [1] : vector<1x4x2x128xf32> to vector<1x2x128xf32>
    %2 = vector.shape_cast %1 : vector<1x2x128xf32> to vector<1x1x2x128xf32>
    %3 = vector.broadcast %2 : vector<1x1x2x128xf32> to vector<1x4x2x128xf32>
    %4 = arith.subf %0, %3 : vector<1x4x2x128xf32>
    %cst_3 = arith.constant 5.000000e-01 : f32
    %5 = vector.broadcast %cst_3 : f32 to vector<1x4x2x128xf32>
    %6 = arith.mulf %4, %5 : vector<1x4x2x128xf32>
    %7 = math.exp %6 : vector<1x4x2x128xf32>
    %cst_4 = arith.constant dense<0.000000e+00> : vector<1x2x128xf32>
    %8 = vector.multi_reduction <add>, %7, %cst_4 [1] : vector<1x4x2x128xf32> to vector<1x2x128xf32>
    %9 = vector.shape_cast %8 : vector<1x2x128xf32> to vector<1x1x2x128xf32>
    %10 = tpu.reciprocal %9 : vector<1x1x2x128xf32> -> vector<1x1x2x128xf32>
    %11 = vector.broadcast %10 : vector<1x1x2x128xf32> to vector<1x4x2x128xf32>
    %12 = arith.mulf %7, %11 : vector<1x4x2x128xf32>
    %c0_5 = arith.constant 0 : index
    %c0_6 = arith.constant 0 : index
    %c0_7 = arith.constant 0 : index
    %c0_8 = arith.constant 0 : index
    %13 = vector.load %arg3[%c0_5, %c0_6, %c0_7, %c0_8] : memref<1x4x2x128xf32, #tpu.memory_space<vmem>>, vector<1x4x2x128xf32>
    tpu.vector_store %arg3[%c0_5, %c0_6, %c0_7, %c0_8], %12 {strides = array<i32>} : memref<1x4x2x128xf32, #tpu.memory_space<vmem>>, vector<1x4x2x128xf32>,
    return
  }
  func.func @transform_0(%arg0: i32, %arg1: i32) -> (i32, i32, i32, i32) {
    %c0_i32 = arith.constant 0 : i32
    %c0_i32_0 = arith.constant 0 : i32
    %c0_i32_1 = arith.constant 0 : i32
    return %arg0, %c0_i32, %arg1, %c0_i32_0 : i32, i32, i32, i32
  }
  func.func @transform_1(%arg0: i32, %arg1: i32) -> (i32, i32, i32, i32) {
    %c0_i32 = arith.constant 0 : i32
    %c0_i32_0 = arith.constant 0 : i32
    %c0_i32_1 = arith.constant 0 : i32
    return %arg0, %c0_i32, %arg1, %c0_i32_0 : i32, i32, i32, i32
  }
}

</mosaic_0001>

<bundles_post_ra>
// kernel: tpu_custom_call.1
= control target key start
LH: loop header
LB: loop body
LE: loop exit
PB: predicated region body
PF: predicated region fallthrough
CT: control target
= control target key end

     0   :  { %6 = vsyncpa [#allocation3], 0  ;;  %s706_s0 = inlined_call_operand.hbm [shape: f32[2,4,2,128], index: 0, kind: input, shape index: {}]   ;;  %s707_s1 = inlined_call_operand.hbm [shape: f32[2,4,2,128], index: 1, kind: output, shape index: {}]  }
   0x1   :  { %8 = vsyncpa [#allocation3 + $0x1], 0 }
   0x2   :  { %9 = vsyncpa [#allocation4], 0 }
   0x3   :  { %11 = vsyncpa [#allocation4 + $0x1], 0  ;;  %s519_s6 = smov 0   ;;  %s521_s7 = smov 0  }
   0x4   :  { %s523_s8 = smov 0   ;;  %s525_s9 = smov 0  }
   0x5   :  { %s527_s10 = smov 0   ;;  %s529_s11 = smov 0  }
   0x6 LB: > { %s296_s12 = sadd.s32 4294967295, %s501_s11   ;;  %s297_s13 = sadd.s32 4294967294, %s501_s11   ;;  %s501_s11 = sphi %s529_s11, %s17_s11   ;;  %s497_s10 = sphi %s527_s10, %s722_s10   ;;  %s493_s9 = sphi %s525_s9, %s721_s9   ;;  %s489_s8 = sphi %s523_s8, %s720_s8   ;;  %s485_s7 = sphi %s521_s7, %s719_s7   ;;  %s481_s6 = sphi %s519_s6, %s718_s6  }
   0x7   : > { %s29_s14 = sadd.s32 1, %s497_s10  ;;  %s38_s15 = sadd.s32 1, %s489_s8 }
   0x8   : > { %p31_p0 = scmp.ge.s32.totalorder %s29_s14, 2  ;;  %p45_p1 = scmp.ne.s32.totalorder %s489_s8, %s485_s7 }
   0x9   : > { %p46_p2 = scmp.eq.s32.totalorder %s501_s11, 0  ;;  %p51_p3 = scmp.ne.s32.totalorder %s485_s7, %s481_s6 }
   0xa   : > { %s724_s14 = smov (%p31_p0, %s29_s14), 0  ;;  %p52_p5 = scmp.eq.s32.totalorder %s296_s12, 0 }
   0xb   : > { %p560_p4 = por %p46_p2, %p45_p1  ;;  %s33_s17 = ssub.s32 %s497_s10, %s724_s14 }
   0xc   : > { %p77_p6 = scmp.eq.s32.totalorder %s296_s12, 1  ;;  %p36_p7 = scmp.eq.s32.totalorder %s33_s17, 0 }
   0xd   : > { %p566_p8 = por %p52_p5, %p51_p3  ;;  %p83_p10 = scmp.eq.s32.totalorder %s297_s13, 1 }
   0xe   : > { %p570_p9 = por %p77_p6, %p45_p1  ;;  %p325_p13 = scmp.lt.s32.totalorder %s501_s11, 2 }
   0xf   : > { %s575_s20 = scalar_select %p36_p7, %s489_s8, %s38_s15  }
  0x10   : > { %s711_s19 = scalar_select %p570_p9, 1, 0 }
  0x11   : > { %p577_p11 = por %p83_p10, %p51_p3  ;;  %s103_s22 = sand.u32 1, %s489_s8  }
  0x12   : > { %s300_s23 = sshll.u32 %s103_s22, 3  ;;  %s311_s24 = sshll.u32 %s497_s10, 7 }
  0x13   : > { %s712_s21 = scalar_select %p577_p11, 1, 0 }
  0x14   : > { %s588_s27 = scalar_lea.hbm %s706_s0, %s311_s24  ;;  %s107_s28 = scalar_lea.vmem [#allocation2], %s300_s23 }
  0x15   : > { %s115_s29 = sshll.u32 %s107_s28, 4  ;;  %p594_p0 = pnand %p325_p13, %p560_p4  ;;  %s590_s29 = int_to_ptr.vmem [resolvable:$true] %s115_s29 }
  0x16   : > { %s599_s2 = scalar_lea.sflag [#allocation3], %s103_s22  ;;  %s389_s3 = scalar_lea.hbm %s588_s27, 128 }
  0x17   : > { %p390_p2 = scmp.ne.s32.totalorder %s588_s27, %s389_s3  ;;  %p391_p3 = pneg %p594_p0 }
  0x18   : > { %s394_s12 = scalar_lea.hbm %s706_s0, 256  ;;  %p395_p4 = scmp.lt.u32.totalorder %s588_s27, %s706_s0 }
  0x19   : > { %p392_p5 = pnand %p391_p3, %p390_p2  ;;  %p396_p7 = scmp.lt.u32.totalorder %s394_s12, %s389_s3 }
  0x1a   : > { %p398_p13 = scmp.lt.u32.totalorder %s389_s3, %s588_s27 }
  0x1b   : > { %p393_p6 = pneg %p392_p5  ;;  %p397_p10 = por %p396_p7, %p395_p4 }
  0x1d   : > { %p399_p12 = por %p398_p13, %p397_p10 }
  0x1f   : > { %p400_p1 = pnand %p399_p12, %p393_p6 }
  0x21   : > { %403 = shalt.err (!%p400_p1)
}
  0x22   : > { %s404_s16 = scalar_lea.vmem %s590_s29, 128  ;;  %s503_s17 = smov [#allocation2]  }
  0x23   : > { %p405_p2 = scmp.ne.s32.totalorder %s590_s29, %s404_s16  ;;  %s409_s22 = sshll.u32 %s503_s17, 4  ;;  %s410_s22 = int_to_ptr.vmem [resolvable:$false] %s409_s22 }
  0x24   : > { %s411_s23 = scalar_lea.vmem %s410_s22, 256  ;;  %p412_p9 = scmp.lt.s32.totalorder %s590_s29, %s410_s22 }
  0x25   : > { %p407_p5 = pnand %p405_p2, %p391_p3  ;;  %p413_p4 = scmp.lt.s32.totalorder %s411_s23, %s404_s16 }
  0x27   : > { %p408_p11 = pneg %p407_p5  ;;  %p414_p7 = por %p413_p4, %p412_p9 }
  0x29   : > { %p415_p10 = pnand %p414_p7, %p408_p11 }
  0x2b   : > { %418 = shalt.err (!%p415_p10)
}
  0x2c   : > { %s504_s24 = smov 32   ;;  %s505_s25 = smov 2  }
  0x2d   : > { %320 = dma.hbm_to_vmem [thread:$0]  (!%p594_p0), %s588_s27, 128, %s590_s29, %s599_s2, %s504_s24, %s504_s24, %s505_s25  }
  0x2e   : > { %p123_p12 = scmp.lt.s32.totalorder %s501_s11, 3  ;;  %p714_p1 = scmp.ge.s32.totalorder %s501_s11, 1 }
  0x30   : > { %p124_p3 = pnand %p714_p1, %p123_p12 }
  0x31   : > { %s631_s26 = sand.u32 (!%p124_p3), 1, %s485_s7  }
  0x32   : > { %127 = sbr.rel (%p124_p3) target bundleno = 119 (0x77), region = 24  ;;  %s304_s28 = sshll.u32 (!%p124_p3), %s631_s26, 3 }
  0x33   : > { %s130_s3 = scalar_lea.sflag (!%p124_p3), [#allocation3], %s631_s26  ;;  %s133_s4 = scalar_lea.vmem (!%p124_p3), [#allocation2], %s304_s28 }
  0x39   : > { %472 = dma.done.wait (%p566_p8), %s130_s3, 128  }
  0x3a   : > { %474 = vsyncadd (%p566_p8), %s130_s3, 4294967168  ;;  %vm156_vm0 = vcmask 1041408   ;;  %v152_v0 = vld [vmem:[%s133_s4] sm:$0x3]  ;;  %v153_v1 = vld [vmem:[%s133_s4 + $0x2] sm:$0x3] }
  0x3b   : > { %v154_v2 = vld [vmem:[%s133_s4 + $0x4] sm:$0x3]  ;;  %v155_v3 = vld [vmem:[%s133_s4 + $0x6] sm:$0x3]  ;;  %v157_v4 = vsel %vm156_vm0, %v152_v0, -inf  ;;  %v158_v5 = vsel %vm156_vm0, %v153_v1, -inf }
  0x3c   : > { %v159_v6 = vsel %vm156_vm0, %v154_v2, -inf  ;;  %v160_v7 = vsel %vm156_vm0, %v155_v3, -inf  ;;  %v161_v8 = vmax.f32 %v157_v4, %v158_v5  ;;  %s151_s18 = scalar_lea.vmem [#allocation5], %s304_s28  ;;  %s312_s29 = sshll.u32 %s493_s9, 7 }
  0x3d   : > { %v162_v9 = vmax.f32 %v159_v6, %v160_v7  ;;  %s211_s27 = sshll.u32 %s151_s18, 4  ;;  %s657_s5 = scalar_lea.hbm %s707_s1, %s312_s29  ;;  %s652_s27 = int_to_ptr.vmem [resolvable:$true] %s211_s27 }
  0x3e   : > { %s197_s9 = scalar_lea.sflag [#allocation4], %s631_s26  ;;  %s419_s12 = scalar_lea.vmem %s652_s27, 128 }
  0x3f   : > { %v163_v10 = vmax.f32 %v161_v8, %v162_v9  ;;  %p420_p8 = scmp.ne.s32.totalorder %s652_s27, %s419_s12  ;;  %p715_p9 = scmp.ne.s32.totalorder %s711_s19, 0 }
  0x40   : > { %s506_s13 = smov [#allocation5]  }
  0x41   : > { %v164_v11 = vsub.f32 %v152_v0, %v163_v10  ;;  %v165_v12 = vsub.f32 %v153_v1, %v163_v10  ;;  %v166_v13 = vsub.f32 %v154_v2, %v163_v10  ;;  %v167_v14 = vsub.f32 %v155_v3, %v163_v10  ;;  %p421_p11 = pnand %p420_p8, %p715_p9  ;;  %s423_s15 = sshll.u32 %s506_s13, 4  ;;  %s424_s15 = int_to_ptr.vmem [resolvable:$false] %s423_s15 }
  0x42   : > { %s425_s16 = scalar_lea.vmem %s424_s15, 256  ;;  %p426_p6 = scmp.lt.s32.totalorder %s652_s27, %s424_s15 }
  0x43   : > { %v168_v15 = vmul.f32 0.5, %v164_v11  ;;  %v169_v16 = vmul.f32 0.5, %v165_v12  ;;  %v170_v17 = vmul.f32 0.5, %v166_v13  ;;  %v171_v18 = vmul.f32 0.5, %v167_v14  ;;  %p422_p0 = pneg %p421_p11  ;;  %p427_p13 = scmp.lt.s32.totalorder %s425_s16, %s419_s12 }
  0x45   : > { %v172_v19 = vmul.f32 1.442695, %v168_v15  ;;  %v174_v20 = vmul.f32 1.442695, %v169_v16  ;;  %v176_v21 = vmul.f32 1.442695, %v170_v17  ;;  %p428_p2 = por %p427_p13, %p426_p6 }
  0x46   : > { %v178_v22 = vmul.f32 1.442695, %v171_v18 }
  0x47   : > { %379 = vpow2.f32 %v172_v19  ;;  %p429_p5 = pnand %p428_p2, %p422_p0 }
  0x48   : > { %381 = vpow2.f32 %v174_v20 }
  0x49   : > { %383 = vpow2.f32 %v176_v21 }
  0x4a   : > { %385 = vpow2.f32 %v178_v22 }
  0x51   : > { %v380_v23 = vpop.eup %379 }
  0x52   : > { %v382_v24 = vpop.eup %381  ;;  %v180_v25 = vsel %vm156_vm0, %v380_v23, 0.0 }
  0x53   : > { %v384_v26 = vpop.eup %383  ;;  %v181_v27 = vsel %vm156_vm0, %v382_v24, 0.0 }
  0x54   : > { %v386_v28 = vpop.eup %385  ;;  %v182_v29 = vadd.f32 %v181_v27, %v180_v25  ;;  %v183_v30 = vsel %vm156_vm0, %v384_v26, 0.0 }
  0x55   : > { %v185_v31 = vsel %vm156_vm0, %v386_v28, 0.0 }
  0x56   : > { %v184_v32 = vadd.f32 %v183_v30, %v182_v29 }
  0x58   : > { %v186_v33 = vadd.f32 %v185_v31, %v184_v32 }
  0x5a   : > { %387 = vrcp.f32 %v186_v33 }
  0x64   : > { %v388_v34 = vpop.eup %387 }
  0x65   : > { %v188_v35 = vmul.f32 %v388_v34, %v380_v23  ;;  %v189_v36 = vmul.f32 %v388_v34, %v382_v24  ;;  %v190_v37 = vmul.f32 %v388_v34, %v384_v26  ;;  %v191_v38 = vmul.f32 %v388_v34, %v386_v28 }
  0x67   : > { %192 = vst [vmem:[%s151_s18] sm:$0x3] %v188_v35  ;;  %193 = vst [vmem:[%s151_s18 + $0x2] sm:$0x3] %v189_v36 }
  0x68   : > { %194 = vst [vmem:[%s151_s18 + $0x4] sm:$0x3] %v190_v37  ;;  %195 = vst [vmem:[%s151_s18 + $0x6] sm:$0x3] %v191_v38 }
  0x69   : > { %432 = shalt.err (!%p429_p5)
}
  0x6a   : > { %s433_s17 = scalar_lea.hbm %s657_s5, 128  ;;  %s437_s24 = scalar_lea.hbm %s707_s1, 256 }
  0x6b   : > { %p434_p4 = scmp.ne.s32.totalorder %s657_s5, %s433_s17  ;;  %p438_p12 = scmp.lt.u32.totalorder %s657_s5, %s707_s1 }
  0x6c   : > { %p439_p1 = scmp.lt.u32.totalorder %s437_s24, %s433_s17  ;;  %p441_p8 = scmp.lt.u32.totalorder %s433_s17, %s657_s5 }
  0x6d   : > { %p435_p7 = pnand %p434_p4, %p715_p9 }
  0x6e   : > { %p440_p3 = por %p439_p1, %p438_p12 }
  0x6f   : > { %p436_p10 = pneg %p435_p7 }
  0x70   : > { %p442_p11 = por %p441_p8, %p440_p3 }
  0x72   : > { %p443_p0 = pnand %p442_p11, %p436_p10 }
  0x74   : > { %446 = shalt.err (!%p443_p0)
}
  0x75   : > { %s507_s3 = smov 32   ;;  %s508_s4 = smov 2  }
  0x76   : > { %315 = dma.vmem_to_hbm [thread:$0]  (%p715_p9), %s652_s27, 128, %s657_s5, %s197_s9, %s507_s3, %s507_s3, %s508_s4  }
  0x77 PF: > { %s226_s18 = sand.u32 1, %s481_s6   ;;  %p716_p6 = scmp.ne.s32.totalorder %s712_s21, 0 }
  0x78   : > { %p717_p13 = scmp.ge.s32.totalorder %s501_s11, 2  ;;  %s227_s29 = scalar_lea.sflag [#allocation4], %s226_s18 }
  0x7a   : > { %p322_p2 = pnand %p717_p13, %p716_p6 }
  0x7c   : > { %476 = dma.done.wait (!%p322_p2), %s227_s29, 128  }
  0x7d   : > { %478 = vsyncadd (!%p322_p2), %s227_s29, 4294967168  ;;  %s17_s11 = sadd.s32 1, %s501_s11   ;;  %s718_s6 = smov %s485_s7 }
  0x7e   : > { %p14_p5 = scmp.ge.s32.totalorder %s17_s11, 4   ;;  %s719_s7 = smov %s489_s8 }
  0x7f   : > { %s720_s8 = smov %s575_s20  ;;  %s721_s9 = smov %s497_s10 }
  0x80   : > { %s722_s10 = smov %s724_s14  ;;  %16 = sbr.rel (!%p14_p5) target bundleno = 6 (0x6), region = 69 }
  0x87   :  { %232 = vsyncpa [#allocation3], 1 }
  0x88   :  { %234 = vsyncpa [#allocation3 + $0x1], 1 }
  0x89   :  { %235 = vsyncpa [#allocation4], 1 }
  0x8a   :  { %237 = vsyncpa [#allocation4 + $0x1], 1 }

</bundles_post_ra>
